<compile_context>
chip_gen: v6e
topology: v6e:2x2x1
jax: 0.10.0
libtpu: 0.0.40
codegen_flags: <defaults>
</compile_context>

<pallas_src>
import functools
import math

import jax
import jax.numpy as jnp
from jax.experimental import pallas as pl
from jax.experimental.pallas import tpu as pltpu


# --------------------------------------------------------------------- tiling helpers
def _pick_tile_rows(batch, row_bytes, target_bytes=1 << 20, max_bytes=4 << 20):
    """Largest divisor `tb` of `batch` whose per-step block stays under max_bytes,
    stopping once it reaches target_bytes, while keeping >= 2 grid steps (v7x
    megacore) whenever batch >= 2."""
    best = 1
    for tb in range(1, batch + 1):
        if batch % tb:
            continue
        if batch >= 2 and batch // tb < 2:
            break
        if tb * row_bytes > max_bytes:
            break
        best = tb
        if tb * row_bytes >= target_bytes:
            break
    return best


def _pick_chunk(feat, tb, budget_bytes=2 << 20):
    """Largest divisor of feat so the (tb, ci, feat) compare chunk stays ~budget."""
    limit = max(1, budget_bytes // max(1, tb * feat * 4))
    ci = 1
    for d in range(1, feat + 1):
        if feat % d == 0 and d <= limit:
            ci = d
    return ci


# ------------------------------------------------------ consecutive (time-series) mask
@functools.lru_cache(maxsize=None)
def _consecutive_fn(batch, seq, feat, target, min_w, max_w):
    n_iters = max(1, math.ceil(target / min_w))
    row_bytes = seq * feat + n_iters * feat * 4          # int8 output + packed int32 draws
    tb = _pick_tile_rows(batch, row_bytes)
    nblk = batch // tb
    lanes = tb * feat                                    # tb batch rows packed onto lanes

    def kernel(draws_ref, masked_ref, total_ref):
        # draws_ref : (n_iters, lanes) int32 -- bits [0,15): width draw, [15,30): start draw
        # masked_ref: (seq, lanes)    int8  -- output tile, accumulated in place
        # total_ref : (1, lanes)      int32 -- masked-so-far count per (row, feature) column
        t_idx = jax.lax.broadcasted_iota(jnp.int32, (seq, lanes), 0)
        masked_ref[...] = jnp.zeros_like(masked_ref)
        total_ref[...] = jnp.zeros_like(total_ref)

        @pl.loop(0, n_iters, unroll=(n_iters <= 8))
        def _(it):
            r = draws_ref[pl.ds(it, 1), :]                          # (1, lanes)
            rw = r & 0x7FFF
            rs = (r >> 15) & 0x7FFF
            total = total_ref[...]                                  # (1, lanes)
            active = total < target
            remaining = seq - total
            wmax = jnp.maximum(jnp.minimum(max_w, remaining), min_w)
            wsize = min_w + ((rw * (wmax - min_w + 1)) >> 15)       # ~uniform in [min_w, wmax]
            start = (rs * (seq - wsize + 1)) >> 15                  # ~uniform in [0, seq-wsize]
            overshoot = jnp.maximum(total + wsize - target, 0)
            eff_end = start + wsize - overshoot
            win = (t_idx >= start) & (t_idx < eff_end) & active     # (seq, lanes) via sublane bcast
            masked_ref[...] = jnp.where(win, jnp.int8(1), masked_ref[...])
            total_ref[...] = total + jnp.where(active, wsize - overshoot, 0)

    call = pl.pallas_call(
        kernel,
        out_shape=jax.ShapeDtypeStruct((nblk, seq, lanes), jnp.int8),
        grid=(nblk,),
        in_specs=[pl.BlockSpec((None, n_iters, lanes), lambda b: (b, 0, 0))],
        out_specs=pl.BlockSpec((None, seq, lanes), lambda b: (b, 0, 0)),
        scratch_shapes=[pltpu.VMEM((1, lanes), jnp.int32)],
        compiler_params=pltpu.CompilerParams(
            dimension_semantics=("parallel",),
            vmem_limit_bytes=int(32 * 2**20)),
    )

    def run(key):
        kw, ks = jax.random.split(key)
        rw = jax.random.randint(kw, (batch, n_iters, feat), 0, 1 << 15, dtype=jnp.int32)
        rs = jax.random.randint(ks, (batch, n_iters, feat), 0, 1 << 15, dtype=jnp.int32)
        draws = rw | (rs << 15)                                     # pack: half the input bytes
        draws = draws.reshape(nblk, tb, n_iters, feat).transpose(0, 2, 1, 3)
        draws = draws.reshape(nblk, n_iters, lanes)                 # batch-major contiguous slab
        out = call(draws)                                           # (nblk, seq, tb*feat) int8
        out = out.reshape(nblk, seq, tb, feat).transpose(0, 2, 1, 3).reshape(batch, seq, feat)
        masked = out.astype(jnp.bool_)
        return jnp.logical_not(masked), masked

    return jax.jit(run)


# ---------------------------------------------------------- isolated-point (static) mask
@functools.lru_cache(maxsize=None)
def _point_fn(batch, feat, k):
    # per-row VMEM estimate: the (feat, 1) column operand pads to 128 lanes in VMEM.
    row_bytes = feat * 128 * 4 + feat * 4 + feat
    tb = _pick_tile_rows(batch, row_bytes)
    nblk = batch // tb
    ci = _pick_chunk(feat, tb)           # sublane chunk of the O(feat^2) pairwise compare
    use_mxu = feat >= 256                # offload the rank-sum to the otherwise-idle MXU

    def kernel(col_ref, row_ref, masked_ref):
        # col_ref: (tb, feat, 1) keys on sublanes ; row_ref: (tb, 1, feat) keys on lanes
        s_j = row_ref[...]
        if use_mxu:
            ones = jnp.ones((tb, 1, ci), jnp.bfloat16)              # hoisted out of the chunk loop
            rank = jnp.zeros((tb, 1, feat), jnp.float32)
        else:
            rank = jnp.zeros((tb, 1, feat), jnp.int32)
        for c0 in range(0, feat, ci):
            s_i = col_ref[:, c0:c0 + ci, :]                         # (tb, ci, 1) static slice
            smaller = s_i < s_j                                     # keys unique -> no tie-break
            if use_mxu:
                rank = rank + jnp.einsum("bki,bij->bkj", ones,
                                         smaller.astype(jnp.bfloat16),
                                         preferred_element_type=jnp.float32)
            else:
                rank = rank + jnp.sum(smaller.astype(jnp.int32), axis=1, keepdims=True)
        thresh = jnp.float32(k) if use_mxu else jnp.int32(k)
        masked_ref[...] = (rank < thresh).astype(jnp.int8)          # exactly k per row

    call = pl.pallas_call(
        kernel,
        out_shape=jax.ShapeDtypeStruct((batch, 1, feat), jnp.int8),
        grid=(nblk,),
        in_specs=[pl.BlockSpec((tb, feat, 1), lambda b: (b, 0, 0)),
                  pl.BlockSpec((tb, 1, feat), lambda b: (b, 0, 0))],
        out_specs=pl.BlockSpec((tb, 1, feat), lambda b: (b, 0, 0)),
        compiler_params=pltpu.CompilerParams(
            dimension_semantics=("parallel",),
            vmem_limit_bytes=int(32 * 2**20)),
    )

    def run(key):
        bits = max(1, (feat - 1).bit_length())
        rand = jax.random.randint(key, (batch, feat), 0, 1 << (30 - bits), dtype=jnp.int32)
        keys = (rand << bits) | jnp.arange(feat, dtype=jnp.int32)[None, :]   # strictly unique keys
        masked = call(keys[:, :, None], keys[:, None, :])[:, 0, :].astype(jnp.bool_)
        return jnp.logical_not(masked), masked

    return jax.jit(run)


# ---------------------------------------------------------------------------- wrapper
class MaskGenerator:
    """JAX/Pallas port of the PyTorch MaskGenerator forward pass."""

    def __init__(self, mask_ratio_time_series, mask_ratio_static=None,
                 min_window_size=None, max_window_size=None):
        self.mask_ratio_time_series = mask_ratio_time_series
        self.mask_ratio_static = mask_ratio_static
        self.min_window_size = min_window_size
        self.max_window_size = max_window_size

    def __call__(self, data_shape, method="consecutive", seed=0):
        key = jax.random.PRNGKey(seed)
        if method in ("consecutive",):
            batch, seq, feat = (int(x) for x in data_shape)
            target = int(seq * self.mask_ratio_time_series)
            assert target > 0, "Mask ratio is too small or sequence is too short!"
            min_w = int(self.min_window_size)
            max_w = int(self.max_window_size)
            assert 1 <= min_w <= max_w <= seq, "window sizes must satisfy 1 <= min <= max <= seq"
            fn = _consecutive_fn(batch, seq, feat, target, min_w, max_w)
        elif method in ("isolated_point", "point"):
            batch, feat = (int(x) for x in data_shape)
            k = int(feat * self.mask_ratio_static)
            assert k > 0, "Mask ratio is too small or number of features is too small!"
            fn = _point_fn(batch, feat, k)
        else:
            raise ValueError("Unknown masking method!")
        unmasked, masked = fn(key)
        self.unmasked_index = unmasked
        self.masked_index = masked
        return (unmasked, masked)

    forward = __call__


# ------------------------------------------------------------------------------- main
if __name__ == "__main__":
    gen = MaskGenerator(mask_ratio_time_series=0.25, mask_ratio_static=0.25,
                        min_window_size=1, max_window_size=3)

    # consecutive (time-series) masking: data_shape = (batch, seq, features)
    B, S, F = 4, 8, 16
    unmasked, masked = gen((B, S, F), method="consecutive", seed=0)
    jax.block_until_ready((unmasked, masked))
    assert unmasked.shape == (B, S, F) and masked.shape == (B, S, F)
    assert unmasked.dtype == jnp.bool_ and masked.dtype == jnp.bool_
    assert bool(jnp.all(unmasked == jnp.logical_not(masked)))
    target = int(S * 0.25)
    per_col = jnp.sum(masked, axis=1)            # masked steps per (batch, feature) column
    assert bool(jnp.all((per_col >= 1) & (per_col <= target)))

    # isolated-point (static) masking: data_shape = (batch, features)
    unm_p, msk_p = gen((B, F), method="point", seed=1)
    jax.block_until_ready((unm_p, msk_p))
    assert msk_p.shape == (B, F) and msk_p.dtype == jnp.bool_
    assert bool(jnp.all(unm_p == jnp.logical_not(msk_p)))
    assert bool(jnp.all(jnp.sum(msk_p, axis=-1) == int(F * 0.25)))

    print("KERNEL_OK")
</pallas_src>

<mosaic_0001>
module attributes {stable_mosaic.version = 11 : i64} {
  func.func @kernel(%arg0: i32, %arg1: memref<1x2x32xi32, #tpu.memory_space<vmem>>, %arg2: memref<1x8x32xi8, #tpu.memory_space<vmem>>, %arg3: memref<1x32xi32, #tpu.memory_space<vmem>>) attributes {dimension_semantics = [#tpu.dimension_semantics<parallel>], iteration_bounds = array<i64: 2>, scalar_prefetch = 0 : i64, scratch_operands = 1 : i64, tpu.core_type = #tpu.core_type<tc>, window_params = [{transform_indices = @transform_0, window_bounds = array<i64: 1, 2, 32>}, {transform_indices = @transform_1, window_bounds = array<i64: 1, 8, 32>}]} {
    %0 = tpu.iota {dimensions = array<i32: 0>} : vector<8x32xi32>
    %c0_i8 = arith.constant 0 : i8
    %1 = vector.broadcast %c0_i8 : i8 to vector<8x32xi8>
    %c0 = arith.constant 0 : index
    %c0_0 = arith.constant 0 : index
    %c0_1 = arith.constant 0 : index
    %2 = vector.load %arg2[%c0, %c0_0, %c0_1] : memref<1x8x32xi8, #tpu.memory_space<vmem>>, vector<1x8x32xi8>
    %3 = vector.shape_cast %2 : vector<1x8x32xi8> to vector<8x32xi8>
    %4 = vector.shape_cast %1 : vector<8x32xi8> to vector<1x8x32xi8>
    tpu.vector_store %arg2[%c0, %c0_0, %c0_1], %4 {strides = array<i32>} : memref<1x8x32xi8, #tpu.memory_space<vmem>>, vector<1x8x32xi8>,
    %c0_i32 = arith.constant 0 : i32
    %5 = vector.broadcast %c0_i32 : i32 to vector<1x32xi32>
    %c0_2 = arith.constant 0 : index
    %c0_3 = arith.constant 0 : index
    %6 = vector.load %arg3[%c0_2, %c0_3] : memref<1x32xi32, #tpu.memory_space<vmem>>, vector<1x32xi32>
    tpu.vector_store %arg3[%c0_2, %c0_3], %5 {strides = array<i32>} : memref<1x32xi32, #tpu.memory_space<vmem>>, vector<1x32xi32>,
    %c0_i32_4 = arith.constant 0 : i32
    %c1_i32 = arith.constant 1 : i32
    %7 = arith.muli %c0_i32_4, %c1_i32 : i32
    %c0_i32_5 = arith.constant 0 : i32
    %8 = arith.addi %c0_i32_5, %7 : i32
    %c0_6 = arith.constant 0 : index
    %9 = arith.index_cast %8 : i32 to index
    %c0_7 = arith.constant 0 : index
    %10 = vector.load %arg1[%c0_6, %9, %c0_7] : memref<1x2x32xi32, #tpu.memory_space<vmem>>, vector<1x1x32xi32>
    %11 = vector.shape_cast %10 : vector<1x1x32xi32> to vector<1x32xi32>
    %c32767_i32 = arith.constant 32767 : i32
    %12 = vector.broadcast %c32767_i32 : i32 to vector<1x32xi32>
    %13 = arith.andi %11, %12 : vector<1x32xi32>
    %c15_i32 = arith.constant 15 : i32
    %14 = vector.broadcast %c15_i32 : i32 to vector<1x32xi32>
    %15 = arith.shrsi %11, %14 : vector<1x32xi32>
    %c32767_i32_8 = arith.constant 32767 : i32
    %16 = vector.broadcast %c32767_i32_8 : i32 to vector<1x32xi32>
    %17 = arith.andi %15, %16 : vector<1x32xi32>
    %c0_9 = arith.constant 0 : index
    %c0_10 = arith.constant 0 : index
    %18 = vector.load %arg3[%c0_9, %c0_10] : memref<1x32xi32, #tpu.memory_space<vmem>>, vector<1x32xi32>
    %c2_i32 = arith.constant 2 : i32
    %19 = vector.broadcast %c2_i32 : i32 to vector<1x32xi32>
    %20 = arith.cmpi slt, %18, %19 : vector<1x32xi32>
    %c8_i32 = arith.constant 8 : i32
    %21 = vector.broadcast %c8_i32 : i32 to vector<1x32xi32>
    %22 = arith.subi %21, %18 : vector<1x32xi32>
    %c3_i32 = arith.constant 3 : i32
    %23 = vector.broadcast %c3_i32 : i32 to vector<1x32xi32>
    %24 = arith.minsi %23, %22 : vector<1x32xi32>
    %c1_i32_11 = arith.constant 1 : i32
    %25 = vector.broadcast %c1_i32_11 : i32 to vector<1x32xi32>
    %26 = arith.maxsi %24, %25 : vector<1x32xi32>
    %c1_i32_12 = arith.constant 1 : i32
    %27 = vector.broadcast %c1_i32_12 : i32 to vector<1x32xi32>
    %28 = arith.subi %26, %27 : vector<1x32xi32>
    %c1_i32_13 = arith.constant 1 : i32
    %29 = vector.broadcast %c1_i32_13 : i32 to vector<1x32xi32>
    %30 = arith.addi %28, %29 : vector<1x32xi32>
    %31 = arith.muli %13, %30 : vector<1x32xi32>
    %c15_i32_14 = arith.constant 15 : i32
    %32 = vector.broadcast %c15_i32_14 : i32 to vector<1x32xi32>
    %33 = arith.shrsi %31, %32 : vector<1x32xi32>
    %c1_i32_15 = arith.constant 1 : i32
    %34 = vector.broadcast %c1_i32_15 : i32 to vector<1x32xi32>
    %35 = arith.addi %34, %33 : vector<1x32xi32>
    %c8_i32_16 = arith.constant 8 : i32
    %36 = vector.broadcast %c8_i32_16 : i32 to vector<1x32xi32>
    %37 = arith.subi %36, %35 : vector<1x32xi32>
    %c1_i32_17 = arith.constant 1 : i32
    %38 = vector.broadcast %c1_i32_17 : i32 to vector<1x32xi32>
    %39 = arith.addi %37, %38 : vector<1x32xi32>
    %40 = arith.muli %17, %39 : vector<1x32xi32>
    %c15_i32_18 = arith.constant 15 : i32
    %41 = vector.broadcast %c15_i32_18 : i32 to vector<1x32xi32>
    %42 = arith.shrsi %40, %41 : vector<1x32xi32>
    %43 = arith.addi %18, %35 : vector<1x32xi32>
    %c2_i32_19 = arith.constant 2 : i32
    %44 = vector.broadcast %c2_i32_19 : i32 to vector<1x32xi32>
    %45 = arith.subi %43, %44 : vector<1x32xi32>
    %c0_i32_20 = arith.constant 0 : i32
    %46 = vector.broadcast %c0_i32_20 : i32 to vector<1x32xi32>
    %47 = arith.maxsi %45, %46 : vector<1x32xi32>
    %48 = arith.addi %42, %35 : vector<1x32xi32>
    %49 = arith.subi %48, %47 : vector<1x32xi32>
    %50 = vector.broadcast %42 : vector<1x32xi32> to vector<8x32xi32>
    %51 = arith.cmpi sge, %0, %50 : vector<8x32xi32>
    %52 = vector.broadcast %49 : vector<1x32xi32> to vector<8x32xi32>
    %53 = arith.cmpi slt, %0, %52 : vector<8x32xi32>
    %54 = arith.andi %51, %53 : vector<8x32xi1>
    %55 = vector.broadcast %20 : vector<1x32xi1> to vector<8x32xi1>
    %56 = arith.andi %54, %55 : vector<8x32xi1>
    %c0_21 = arith.constant 0 : index
    %c0_22 = arith.constant 0 : index
    %c0_23 = arith.constant 0 : index
    %57 = vector.load %arg2[%c0_21, %c0_22, %c0_23] : memref<1x8x32xi8, #tpu.memory_space<vmem>>, vector<1x8x32xi8>
    %58 = vector.shape_cast %57 : vector<1x8x32xi8> to vector<8x32xi8>
    %c1_i8 = arith.constant 1 : i8
    %59 = vector.broadcast %c1_i8 : i8 to vector<8x32xi8>
    %60 = arith.select %56, %59, %58 : vector<8x32xi1>, vector<8x32xi8>
    %c0_24 = arith.constant 0 : index
    %c0_25 = arith.constant 0 : index
    %c0_26 = arith.constant 0 : index
    %61 = vector.load %arg2[%c0_24, %c0_25, %c0_26] : memref<1x8x32xi8, #tpu.memory_space<vmem>>, vector<1x8x32xi8>
    %62 = vector.shape_cast %61 : vector<1x8x32xi8> to vector<8x32xi8>
    %63 = vector.shape_cast %60 : vector<8x32xi8> to vector<1x8x32xi8>
    tpu.vector_store %arg2[%c0_24, %c0_25, %c0_26], %63 {strides = array<i32>} : memref<1x8x32xi8, #tpu.memory_space<vmem>>, vector<1x8x32xi8>,
    %64 = arith.subi %35, %47 : vector<1x32xi32>
    %c0_i32_27 = arith.constant 0 : i32
    %65 = vector.broadcast %c0_i32_27 : i32 to vector<1x32xi32>
    %66 = arith.select %20, %64, %65 : vector<1x32xi1>, vector<1x32xi32>
    %67 = arith.addi %18, %66 : vector<1x32xi32>
    %c0_28 = arith.constant 0 : index
    %c0_29 = arith.constant 0 : index
    %68 = vector.load %arg3[%c0_28, %c0_29] : memref<1x32xi32, #tpu.memory_space<vmem>>, vector<1x32xi32>
    tpu.vector_store %arg3[%c0_28, %c0_29], %67 {strides = array<i32>} : memref<1x32xi32, #tpu.memory_space<vmem>>, vector<1x32xi32>,
    %c1_i32_30 = arith.constant 1 : i32
    %c1_i32_31 = arith.constant 1 : i32
    %69 = arith.muli %c1_i32_30, %c1_i32_31 : i32
    %c0_i32_32 = arith.constant 0 : i32
    %70 = arith.addi %c0_i32_32, %69 : i32
    %c0_33 = arith.constant 0 : index
    %71 = arith.index_cast %70 : i32 to index
    %c0_34 = arith.constant 0 : index
    %72 = vector.load %arg1[%c0_33, %71, %c0_34] : memref<1x2x32xi32, #tpu.memory_space<vmem>>, vector<1x1x32xi32>
    %73 = vector.shape_cast %72 : vector<1x1x32xi32> to vector<1x32xi32>
    %c32767_i32_35 = arith.constant 32767 : i32
    %74 = vector.broadcast %c32767_i32_35 : i32 to vector<1x32xi32>
    %75 = arith.andi %73, %74 : vector<1x32xi32>
    %c15_i32_36 = arith.constant 15 : i32
    %76 = vector.broadcast %c15_i32_36 : i32 to vector<1x32xi32>
    %77 = arith.shrsi %73, %76 : vector<1x32xi32>
    %c32767_i32_37 = arith.constant 32767 : i32
    %78 = vector.broadcast %c32767_i32_37 : i32 to vector<1x32xi32>
    %79 = arith.andi %77, %78 : vector<1x32xi32>
    %c0_38 = arith.constant 0 : index
    %c0_39 = arith.constant 0 : index
    %80 = vector.load %arg3[%c0_38, %c0_39] : memref<1x32xi32, #tpu.memory_space<vmem>>, vector<1x32xi32>
    %c2_i32_40 = arith.constant 2 : i32
    %81 = vector.broadcast %c2_i32_40 : i32 to vector<1x32xi32>
    %82 = arith.cmpi slt, %80, %81 : vector<1x32xi32>
    %c8_i32_41 = arith.constant 8 : i32
    %83 = vector.broadcast %c8_i32_41 : i32 to vector<1x32xi32>
    %84 = arith.subi %83, %80 : vector<1x32xi32>
    %c3_i32_42 = arith.constant 3 : i32
    %85 = vector.broadcast %c3_i32_42 : i32 to vector<1x32xi32>
    %86 = arith.minsi %85, %84 : vector<1x32xi32>
    %c1_i32_43 = arith.constant 1 : i32
    %87 = vector.broadcast %c1_i32_43 : i32 to vector<1x32xi32>
    %88 = arith.maxsi %86, %87 : vector<1x32xi32>
    %c1_i32_44 = arith.constant 1 : i32
    %89 = vector.broadcast %c1_i32_44 : i32 to vector<1x32xi32>
    %90 = arith.subi %88, %89 : vector<1x32xi32>
    %c1_i32_45 = arith.constant 1 : i32
    %91 = vector.broadcast %c1_i32_45 : i32 to vector<1x32xi32>
    %92 = arith.addi %90, %91 : vector<1x32xi32>
    %93 = arith.muli %75, %92 : vector<1x32xi32>
    %c15_i32_46 = arith.constant 15 : i32
    %94 = vector.broadcast %c15_i32_46 : i32 to vector<1x32xi32>
    %95 = arith.shrsi %93, %94 : vector<1x32xi32>
    %c1_i32_47 = arith.constant 1 : i32
    %96 = vector.broadcast %c1_i32_47 : i32 to vector<1x32xi32>
    %97 = arith.addi %96, %95 : vector<1x32xi32>
    %c8_i32_48 = arith.constant 8 : i32
    %98 = vector.broadcast %c8_i32_48 : i32 to vector<1x32xi32>
    %99 = arith.subi %98, %97 : vector<1x32xi32>
    %c1_i32_49 = arith.constant 1 : i32
    %100 = vector.broadcast %c1_i32_49 : i32 to vector<1x32xi32>
    %101 = arith.addi %99, %100 : vector<1x32xi32>
    %102 = arith.muli %79, %101 : vector<1x32xi32>
    %c15_i32_50 = arith.constant 15 : i32
    %103 = vector.broadcast %c15_i32_50 : i32 to vector<1x32xi32>
    %104 = arith.shrsi %102, %103 : vector<1x32xi32>
    %105 = arith.addi %80, %97 : vector<1x32xi32>
    %c2_i32_51 = arith.constant 2 : i32
    %106 = vector.broadcast %c2_i32_51 : i32 to vector<1x32xi32>
    %107 = arith.subi %105, %106 : vector<1x32xi32>
    %c0_i32_52 = arith.constant 0 : i32
    %108 = vector.broadcast %c0_i32_52 : i32 to vector<1x32xi32>
    %109 = arith.maxsi %107, %108 : vector<1x32xi32>
    %110 = arith.addi %104, %97 : vector<1x32xi32>
    %111 = arith.subi %110, %109 : vector<1x32xi32>
    %112 = vector.broadcast %104 : vector<1x32xi32> to vector<8x32xi32>
    %113 = arith.cmpi sge, %0, %112 : vector<8x32xi32>
    %114 = vector.broadcast %111 : vector<1x32xi32> to vector<8x32xi32>
    %115 = arith.cmpi slt, %0, %114 : vector<8x32xi32>
    %116 = arith.andi %113, %115 : vector<8x32xi1>
    %117 = vector.broadcast %82 : vector<1x32xi1> to vector<8x32xi1>
    %118 = arith.andi %116, %117 : vector<8x32xi1>
    %c0_53 = arith.constant 0 : index
    %c0_54 = arith.constant 0 : index
    %c0_55 = arith.constant 0 : index
    %119 = vector.load %arg2[%c0_53, %c0_54, %c0_55] : memref<1x8x32xi8, #tpu.memory_space<vmem>>, vector<1x8x32xi8>
    %120 = vector.shape_cast %119 : vector<1x8x32xi8> to vector<8x32xi8>
    %c1_i8_56 = arith.constant 1 : i8
    %121 = vector.broadcast %c1_i8_56 : i8 to vector<8x32xi8>
    %122 = arith.select %118, %121, %120 : vector<8x32xi1>, vector<8x32xi8>
    %c0_57 = arith.constant 0 : index
    %c0_58 = arith.constant 0 : index
    %c0_59 = arith.constant 0 : index
    %123 = vector.load %arg2[%c0_57, %c0_58, %c0_59] : memref<1x8x32xi8, #tpu.memory_space<vmem>>, vector<1x8x32xi8>
    %124 = vector.shape_cast %123 : vector<1x8x32xi8> to vector<8x32xi8>
    %125 = vector.shape_cast %122 : vector<8x32xi8> to vector<1x8x32xi8>
    tpu.vector_store %arg2[%c0_57, %c0_58, %c0_59], %125 {strides = array<i32>} : memref<1x8x32xi8, #tpu.memory_space<vmem>>, vector<1x8x32xi8>,
    %126 = arith.subi %97, %109 : vector<1x32xi32>
    %c0_i32_60 = arith.constant 0 : i32
    %127 = vector.broadcast %c0_i32_60 : i32 to vector<1x32xi32>
    %128 = arith.select %82, %126, %127 : vector<1x32xi1>, vector<1x32xi32>
    %129 = arith.addi %80, %128 : vector<1x32xi32>
    %c0_61 = arith.constant 0 : index
    %c0_62 = arith.constant 0 : index
    %130 = vector.load %arg3[%c0_61, %c0_62] : memref<1x32xi32, #tpu.memory_space<vmem>>, vector<1x32xi32>
    tpu.vector_store %arg3[%c0_61, %c0_62], %129 {strides = array<i32>} : memref<1x32xi32, #tpu.memory_space<vmem>>, vector<1x32xi32>,
    %c2_i32_63 = arith.constant 2 : i32
    return
  }
  func.func @transform_0(%arg0: i32) -> (i32, i32, i32) {
    %c0_i32 = arith.constant 0 : i32
    %c0_i32_0 = arith.constant 0 : i32
    %c0_i32_1 = arith.constant 0 : i32
    return %arg0, %c0_i32, %c0_i32_0 : i32, i32, i32
  }
  func.func @transform_1(%arg0: i32) -> (i32, i32, i32) {
    %c0_i32 = arith.constant 0 : i32
    %c0_i32_0 = arith.constant 0 : i32
    %c0_i32_1 = arith.constant 0 : i32
    return %arg0, %c0_i32, %c0_i32_0 : i32, i32, i32
  }
}

</mosaic_0001>

<bundles_post_ra>
// kernel: run.1
= control target key start
LH: loop header
LB: loop body
LE: loop exit
PB: predicated region body
PF: predicated region fallthrough
CT: control target
= control target key end

     0   :  { %s314_s6 = smov 0   ;;  %s352_s0 = inlined_call_operand.vmem [shape: s32[2,2,32], index: 0, kind: input, shape index: {}]   ;;  %s353_s1 = inlined_call_operand.vmem [shape: s8[2,8,32], index: 1, kind: output, shape index: {}]  }
   0x1 LB: > { %s275_s7 = sadd.s32 4294967295, %s301_s6   ;;  %p279_p0 = scmp.ge.s32.totalorder %s301_s6, 1  ;;  %s301_s6 = sphi %s314_s6, %s11_s6  }
   0x2   : > { %p86_p1 = scmp.lt.s32.totalorder %s301_s6, 3 }
   0x4   : > { %p87_p2 = pnand %p279_p0, %p86_p1 }
   0x5   : > { %p104_p3 = scmp.lt.s32.totalorder (!%p87_p2), %s275_s7, 1 }
   0x6   : > { %90 = sbr.rel (%p87_p2) target bundleno = 84 (0x54), region = 24 }
   0xb   : > { %vm118_vm0 = vcmask 253952   ;;  %v303_v0 = vmov 0   ;;  %s355_s7 = smov (!%p104_p3, %s275_s7), 1  ;;  %vm116_vm1 = vcmask 254976   ;;  %v114_v11 = vlaneseq }
   0xc   : > { %119 = vst.msk [vmem:[#allocation2] sm:$0x1] %vm118_vm0, %v303_v0  ;;  %s280_s8 = sshll.u32 %s355_s7, 1 }
   0xd   : > { %s327_s11 = scalar_lea.vmem %s352_s0, %s280_s8  ;;  %s332_s14 = scalar_lea.vmem %s353_s1, %s280_s8  ;;  %v115_v17 = vshrl.u32 %v114_v11, 7 }
   0xe   : > { %117 = vst.msk [vmem:[%s332_s14] sm:$0x3] %vm116_vm1, %v303_v0  ;;  %v120_v2 = vld [vmem:[%s327_s11] sm:$0x1]  ;;  %v171_v32 = vld [vmem:[%s327_s11 + $0x1] sm:$0x1] }
   0xf   : > { %v121_v4 = vand.u32 32767, %v120_v2  ;;  %v122_v8 = vshra.s32 %v120_v2, 15  ;;  %v146_v22 = vsub.s32 0, %v115_v17  ;;  %v172_v36 = vand.u32 32767, %v171_v32 }
  0x10   : > { %v173_v40 = vshra.s32 %v171_v32, 15 }
  0x11   : > { %v123_v12 = vand.u32 32767, %v122_v8 }
  0x12   : > { %v174_v43 = vand.u32 32767, %v173_v40 }
  0x13   : > { %v124_v1 = vld [vmem:[#allocation2] sm:$0x1] }
  0x14   : > { %v126_v3 = vsub.s32 8, %v124_v1  ;;  %vm125_vm5 = vcmp.lt.s32.totalorder %v124_v1, 2 }
  0x15   : > { %v155_v23 = vsel %vm125_vm5, 1, %v303_v0  ;;  %v162_v31 = vld [vmem:[%s332_s14] sm:$0x3] }
  0x16   : > { %vm127_vm2 = vcmp.lt.s32.totalorder %v126_v3, 3  ;;  %v159_v29 = vrot.slane %v155_v23, %v146_v22 }
  0x17   : > { %v128_v5 = vsel %vm127_vm2, %v126_v3, 3 }
  0x18   : > { %vm129_vm3 = vcmp.gt.s32.totalorder %v128_v5, 1  ;;  %vm160_vm9 = vcmp.eq.s32.totalorder %v159_v29, 1 }
  0x19   : > { %v130_v6 = vsel %vm129_vm3, %v128_v5, 1 }
  0x1a   : > { %v131_v7 = vmul.u32 %v130_v6, %v121_v4 }
  0x1c   : > { %v132_v9 = vshra.s32 %v131_v7, 15 }
  0x1e   : > { %v133_v10 = vadd.s32 1, %v132_v9 }
  0x20   : > { %v134_v13 = vsub.s32 8, %v133_v10  ;;  %v138_v14 = vadd.s32 %v133_v10, %v124_v1 }
  0x22   : > { %v135_v15 = vadd.s32 1, %v134_v13  ;;  %v282_v16 = vadd.s32 4294967294, %v138_v14 }
  0x24   : > { %v136_v18 = vmul.u32 %v135_v15, %v123_v12  ;;  %vm140_vm4 = vcmp.gt.s32.totalorder %v282_v16, 0 }
  0x25   : > { %v141_v19 = vsel %vm140_vm4, %v282_v16, 0 }
  0x26   : > { %v137_v20 = vshra.s32 %v136_v18, 15  ;;  %v167_v21 = vsub.s32 %v133_v10, %v141_v19 }
  0x28   : > { %v142_v24 = vadd.s32 %v137_v20, %v133_v10  ;;  %v168_v25 = vsel %vm125_vm5, %v167_v21, 0  ;;  %v147_v28 = vrot.slane %v137_v20, %v146_v22 }
  0x29   : > { %v169_v26 = vadd.s32 %v168_v25, %v124_v1 }
  0x2a   : > { %v143_v27 = vsub.s32 %v142_v24, %v141_v19  ;;  %vm148_vm6 = vcmp.ge.s32.totalorder %v115_v17, %v147_v28 }
  0x2b   : > { %170 = vst.msk [vmem:[#allocation2] sm:$0x1] %vm118_vm0, %v169_v26 }
  0x2c   : > { %v152_v30 = vrot.slane %v143_v27, %v146_v22 }
  0x2e   : > { %vm153_vm7 = vcmp.lt.s32.totalorder %v115_v17, %v152_v30 }
  0x2f   : > { %vm154_vm8 = vmand %vm148_vm6, %vm153_vm7 }
  0x30   : > { %vm161_vm10 = vmand %vm154_vm8, %vm160_vm9 }
  0x31   : > { %vm163_vm11 = vmpackc.low %vm161_vm10, %vm161_vm10 }
  0x32   : > { %vm164_vm12 = vmpackc.even %vm163_vm11, %vm163_vm11  ;;  %v175_v33 = vld [vmem:[#allocation2] sm:$0x1] }
  0x33   : > { %v165_v34 = vsel %vm164_vm12, 16843009, %v162_v31  ;;  %v177_v35 = vsub.s32 8, %v175_v33  ;;  %vm176_vm2 = vcmp.lt.s32.totalorder %v175_v33, 2 }
  0x34   : > { %166 = vst.msk [vmem:[%s332_s14] sm:$0x3] %vm116_vm1, %v165_v34  ;;  %v206_v54 = vsel %vm176_vm2, 1, %v303_v0 }
  0x35   : > { %vm178_vm13 = vcmp.lt.s32.totalorder %v177_v35, 3  ;;  %v210_v58 = vrot.slane %v206_v54, %v146_v22 }
  0x36   : > { %v179_v37 = vsel %vm178_vm13, %v177_v35, 3 }
  0x37   : > { %vm180_vm14 = vcmp.gt.s32.totalorder %v179_v37, 1  ;;  %vm211_vm6 = vcmp.eq.s32.totalorder %v210_v58, 1 }
  0x38   : > { %v181_v38 = vsel %vm180_vm14, %v179_v37, 1 }
  0x39   : > { %v182_v39 = vmul.u32 %v181_v38, %v172_v36 }
  0x3b   : > { %v183_v41 = vshra.s32 %v182_v39, 15  ;;  %v213_v60 = vld [vmem:[%s332_s14] sm:$0x3] }
  0x3d   : > { %v184_v42 = vadd.s32 1, %v183_v41 }
  0x3f   : > { %v185_v44 = vsub.s32 8, %v184_v42  ;;  %v189_v45 = vadd.s32 %v184_v42, %v175_v33 }
  0x41   : > { %v186_v46 = vadd.s32 1, %v185_v44  ;;  %v283_v47 = vadd.s32 4294967294, %v189_v45 }
  0x43   : > { %v187_v48 = vmul.u32 %v186_v46, %v174_v43  ;;  %vm191_vm15 = vcmp.gt.s32.totalorder %v283_v47, 0 }
  0x44   : > { %v192_v49 = vsel %vm191_vm15, %v283_v47, 0 }
  0x45   : > { %v188_v50 = vshra.s32 %v187_v48, 15  ;;  %v218_v51 = vsub.s32 %v184_v42, %v192_v49 }
  0x47   : > { %v193_v52 = vadd.s32 %v188_v50, %v184_v42  ;;  %v219_v53 = vsel %vm176_vm2, %v218_v51, 0  ;;  %v198_v57 = vrot.slane %v188_v50, %v146_v22 }
  0x48   : > { %v220_v55 = vadd.s32 %v219_v53, %v175_v33 }
  0x49   : > { %v194_v56 = vsub.s32 %v193_v52, %v192_v49  ;;  %vm199_vm3 = vcmp.ge.s32.totalorder %v115_v17, %v198_v57 }
  0x4a   : > { %221 = vst.msk [vmem:[#allocation2] sm:$0x1] %vm118_vm0, %v220_v55 }
  0x4b   : > { %v203_v59 = vrot.slane %v194_v56, %v146_v22 }
  0x4d   : > { %vm204_vm4 = vcmp.lt.s32.totalorder %v115_v17, %v203_v59 }
  0x4e   : > { %vm205_vm5 = vmand %vm199_vm3, %vm204_vm4 }
  0x4f   : > { %vm212_vm7 = vmand %vm205_vm5, %vm211_vm6 }
  0x50   : > { %vm214_vm8 = vmpackc.low %vm212_vm7, %vm212_vm7 }
  0x51   : > { %vm215_vm9 = vmpackc.even %vm214_vm8, %vm214_vm8 }
  0x52   : > { %v216_v61 = vsel %vm215_vm9, 16843009, %v213_v60 }
  0x53   : > { %217 = vst.msk [vmem:[%s332_s14] sm:$0x3] %vm116_vm1, %v216_v61 }
  0x54 PF: > { %s11_s6 = sadd.s32 1, %s301_s6  }
  0x55   : > { %p8_p4 = scmp.ge.s32.totalorder %s11_s6, 4  }
  0x57   :  { %10 = sbr.rel (!%p8_p4) target bundleno = 1 (0x1), region = 54 }

</bundles_post_ra>
